<compile_context>
chip_gen: v7x
topology: tpu7x:2x2x1
jax: 0.10.0
libtpu: 0.0.40
codegen_flags: <defaults>
</compile_context>

<pallas_src>
import functools

import jax
import jax.numpy as jnp
from jax.experimental import pallas as pl
from jax.experimental.pallas import tpu as pltpu

LN_EPS = 1e-5  # PyTorch nn.LayerNorm default


def _round_up(x, m):
    return ((x + m - 1) // m) * m


def _cdiv(a, b):
    return (a + b - 1) // b


def _padded_bytes(shape, dtype):
    """Approximate VMEM footprint including (sublane, 128-lane) layout padding."""
    itemsize = jnp.dtype(dtype).itemsize
    sub = 8 * max(1, 4 // itemsize)          # 8 for f32, 16 for bf16, ...
    if len(shape) == 1:
        shape = (1,) + tuple(shape)
    lead = 1
    for d in shape[:-2]:
        lead *= int(d)
    return lead * _round_up(int(shape[-2]), sub) * _round_up(int(shape[-1]), 128) * itemsize


def _cls_head_kernel(x_ref, gamma_ref, beta_ref, w_ref, b_ref, out_ref,
                     acc_ref, *, n_tokens, n_tile):
    # x_ref: (B_tile, N_tile, D); gamma/beta: (1, D); w: (D, C_pad);
    # b: (1, C_pad); out: (B_tile, C_pad); acc: (B_tile, D) f32 scratch.
    k = pl.program_id(1)

    @pl.when(k == 0)
    def _():
        acc_ref[...] = jnp.zeros_like(acc_ref)

    # Thin per-chunk work: accumulate the token sum in f32.
    xf = x_ref[...].astype(jnp.float32)                       # (B_tile, N_tile, D)
    if n_tokens % n_tile != 0:
        # Ragged last chunk: mask tokens past n_tokens (OOB partial-block
        # garbage must not enter the pooled sum).
        tok = jax.lax.broadcasted_iota(jnp.int32, xf.shape, 1)
        xf = jnp.where(tok + k * n_tile < n_tokens, xf, 0.0)
    acc_ref[...] += jnp.sum(xf, axis=1)

    @pl.when(k == pl.num_programs(1) - 1)
    def _():
        # Fold 1/N into the finalize step.
        pooled = acc_ref[...] * (1.0 / float(n_tokens))        # (B_tile, D)

        # LayerNorm over D (biased variance, eps inside rsqrt — PyTorch).
        mu = jnp.mean(pooled, axis=-1, keepdims=True)
        centered = pooled - mu
        var = jnp.mean(centered * centered, axis=-1, keepdims=True)
        normed = centered * jax.lax.rsqrt(var + LN_EPS)
        normed = (normed * gamma_ref[...].astype(jnp.float32)
                  + beta_ref[...].astype(jnp.float32))         # (B_tile, D)

        # Linear: (B_tile, D) @ (D, C_pad) + b (lane-dense output store).
        logits = jnp.dot(normed.astype(w_ref.dtype), w_ref[...],
                         preferred_element_type=jnp.float32)
        out_ref[...] = (logits + b_ref[...].astype(jnp.float32)).astype(out_ref.dtype)


def classification_head(x, gamma, beta, w, b):
    """x: (B, N, D); gamma/beta: (D,); w: (D, C); b: (C,). Returns (B, C) f32."""
    B, N, D = x.shape
    C = w.shape[1]
    x_itemsize = jnp.dtype(x.dtype).itemsize
    C_pad = _round_up(C, 128)                     # lane-dense classifier dim

    # Tiny one-time padding of classifier params only (x is never copied).
    w_p = jnp.pad(w, ((0, 0), (0, C_pad - C))) if C_pad != C else w
    b_p = jnp.pad(b, (0, C_pad - C)) if C_pad != C else b
    gamma2 = gamma.reshape(1, D)
    beta2 = beta.reshape(1, D)
    b2 = b_p.reshape(1, C_pad)

    # ---- per-generation VMEM budget ----
    try:
        vmem_cap = int(pltpu.get_tpu_info().vmem_capacity_bytes)
    except Exception:                              # conservative fallback
        vmem_cap = 64 << 20
    usable = min(vmem_cap - (12 << 20), 100 << 20)  # ~52 MiB v7x, ~100 MiB v5e/v6e

    # ---- batch tile: 8-aligned; keep >=2 blocks when B allows so the
    #      "parallel" axis feeds both TensorCores on v7x ----
    B_tile = min(_round_up(B, 8), 256)
    while B_tile > 8 and _cdiv(B, B_tile) < 2:
        B_tile = max(8, _round_up(B_tile // 2, 8))

    # ---- fixed (non-streaming) VMEM footprint, layout-padded ----
    param_bytes = (2 * _padded_bytes((1, D), gamma.dtype)
                   + _padded_bytes((D, C_pad), w.dtype)
                   + _padded_bytes((1, C_pad), b.dtype))
    out_bytes = _padded_bytes((B_tile, C_pad), jnp.float32)
    acc_bytes = _padded_bytes((B_tile, D), jnp.float32)
    fixed = 2 * (param_bytes + out_bytes) + acc_bytes   # params/out double-buffered

    # ---- token tile: fill the remaining budget (2x buffered x + f32 temp) ----
    D_lanes = _round_up(D, 128)
    bytes_per_tok = B_tile * D_lanes * (2 * x_itemsize + 4)
    avail = max(usable - fixed, 8 * bytes_per_tok)
    n_max = max(8, (avail // bytes_per_tok) // 8 * 8)
    N_tile = int(min(_round_up(N, 8), n_max))

    grid = (_cdiv(B, B_tile), _cdiv(N, N_tile))

    x_tile_bytes = _padded_bytes((B_tile, N_tile, D), x.dtype)
    temp_bytes = _padded_bytes((B_tile, N_tile, D), jnp.float32)
    vmem_need = fixed + 2 * x_tile_bytes + temp_bytes
    vmem_limit = int(min(max(vmem_need + (4 << 20), 32 << 20),
                         vmem_cap - (8 << 20), 100 << 20))

    kernel = functools.partial(_cls_head_kernel, n_tokens=N, n_tile=N_tile)

    out = pl.pallas_call(
        kernel,
        out_shape=jax.ShapeDtypeStruct((B, C_pad), jnp.float32),
        grid_spec=pltpu.PrefetchScalarGridSpec(
            num_scalar_prefetch=0,
            grid=grid,
            in_specs=[
                # streamed activations (native dtype; partial blocks OK)
                pl.BlockSpec((B_tile, N_tile, D), lambda i, k: (i, k, 0)),
                # resident params (same block every step, native dtype)
                pl.BlockSpec((1, D), lambda i, k: (0, 0)),
                pl.BlockSpec((1, D), lambda i, k: (0, 0)),
                pl.BlockSpec((D, C_pad), lambda i, k: (0, 0)),
                pl.BlockSpec((1, C_pad), lambda i, k: (0, 0)),
            ],
            out_specs=pl.BlockSpec((B_tile, C_pad), lambda i, k: (i, 0)),
            scratch_shapes=[pltpu.VMEM((B_tile, D), jnp.float32)],
        ),
        compiler_params=pltpu.CompilerParams(
            dimension_semantics=("parallel", "arbitrary"),
            vmem_limit_bytes=vmem_limit,
        ),
    )(x, gamma2, beta2, w_p, b2)

    return out[:, :C]


def _reference(x, gamma, beta, w, b):
    pooled = jnp.mean(x.astype(jnp.float32), axis=1)
    mu = jnp.mean(pooled, axis=-1, keepdims=True)
    var = jnp.mean((pooled - mu) ** 2, axis=-1, keepdims=True)
    normed = (pooled - mu) / jnp.sqrt(var + LN_EPS) * gamma + beta
    return normed @ w + b


if __name__ == "__main__":
    key = jax.random.PRNGKey(0)
    # batch=2, num_tokens=10 (exercises the ragged-token masking path),
    # attn_embed_dim=32, num_classes=10.
    B, N, D, C = 2, 10, 32, 10

    kx, kw, kb = jax.random.split(key, 3)
    x = jax.random.normal(kx, (B, N, D), dtype=jnp.float32)

    # LayerNorm init: gamma=1, beta=0; Linear: small randoms.
    gamma = jnp.ones((D,), dtype=jnp.float32)
    beta = jnp.zeros((D,), dtype=jnp.float32)
    w = jax.random.normal(kw, (D, C), dtype=jnp.float32) * 0.02
    b = jax.random.normal(kb, (C,), dtype=jnp.float32) * 0.02

    out = classification_head(x, gamma, beta, w, b)
    out = jax.block_until_ready(out)

    ref = _reference(x, gamma, beta, w, b)
    assert out.shape == (B, C)
    assert jnp.allclose(out, ref, atol=1e-4, rtol=1e-4), (out, ref)
    print("KERNEL_OK")
</pallas_src>

<mosaic_0001>
module attributes {stable_mosaic.version = 11 : i64} {
  func.func @_cls_head_kernel(%arg0: i32, %arg1: i32, %arg2: memref<8x16x32xf32, #tpu.memory_space<vmem>>, %arg3: memref<1x32xf32, #tpu.memory_space<vmem>>, %arg4: memref<1x32xf32, #tpu.memory_space<vmem>>, %arg5: memref<32x128xf32, #tpu.memory_space<vmem>>, %arg6: memref<1x128xf32, #tpu.memory_space<vmem>>, %arg7: memref<8x128xf32, #tpu.memory_space<vmem>>, %arg8: memref<8x32xf32, #tpu.memory_space<vmem>>) attributes {dimension_semantics = [#tpu.dimension_semantics<parallel>, #tpu.dimension_semantics<arbitrary>], iteration_bounds = array<i64: 1, 1>, scalar_prefetch = 0 : i64, scratch_operands = 1 : i64, tpu.core_type = #tpu.core_type<tc>, window_params = [{transform_indices = @transform_0, window_bounds = array<i64: 8, 16, 32>}, {pipeline_mode = #tpu.pipeline_mode<synchronous>, transform_indices = @transform_1, window_bounds = array<i64: 1, 32>}, {pipeline_mode = #tpu.pipeline_mode<synchronous>, transform_indices = @transform_2, window_bounds = array<i64: 1, 32>}, {pipeline_mode = #tpu.pipeline_mode<synchronous>, transform_indices = @transform_3, window_bounds = array<i64: 32, 128>}, {pipeline_mode = #tpu.pipeline_mode<synchronous>, transform_indices = @transform_4, window_bounds = array<i64: 1, 128>}, {transform_indices = @transform_5, window_bounds = array<i64: 8, 128>}]} {
    %c0_i32 = arith.constant 0 : i32
    %0 = arith.cmpi eq, %arg1, %c0_i32 : i32
    %1 = arith.extui %0 : i1 to i32
    %c0_i32_0 = arith.constant 0 : i32
    %2 = arith.cmpi ne, %1, %c0_i32_0 : i32
    scf.if %2 {
      %cst_10 = arith.constant 0.000000e+00 : f32
      %19 = vector.broadcast %cst_10 : f32 to vector<8x32xf32>
      %c0_11 = arith.constant 0 : index
      %c0_12 = arith.constant 0 : index
      %20 = vector.load %arg8[%c0_11, %c0_12] : memref<8x32xf32, #tpu.memory_space<vmem>>, vector<8x32xf32>
      tpu.vector_store %arg8[%c0_11, %c0_12], %19 {strides = array<i32>} : memref<8x32xf32, #tpu.memory_space<vmem>>, vector<8x32xf32>,
    } else {
    }
    %c0 = arith.constant 0 : index
    %c0_1 = arith.constant 0 : index
    %c0_2 = arith.constant 0 : index
    %3 = vector.load %arg2[%c0, %c0_1, %c0_2] : memref<8x16x32xf32, #tpu.memory_space<vmem>>, vector<8x16x32xf32>
    %4 = tpu.iota {dimensions = array<i32: 1>} : vector<8x16x32xi32>
    %c16_i32 = arith.constant 16 : i32
    %5 = arith.muli %arg1, %c16_i32 : i32
    %6 = vector.broadcast %5 : i32 to vector<8x16x32xi32>
    %7 = arith.addi %4, %6 : vector<8x16x32xi32>
    %c10_i32 = arith.constant 10 : i32
    %8 = vector.broadcast %c10_i32 : i32 to vector<8x16x32xi32>
    %9 = arith.cmpi slt, %7, %8 : vector<8x16x32xi32>
    %cst = arith.constant 0.000000e+00 : f32
    %10 = vector.broadcast %cst : f32 to vector<8x16x32xf32>
    %11 = arith.select %9, %3, %10 : vector<8x16x32xi1>, vector<8x16x32xf32>
    %c0_3 = arith.constant 0 : index
    %c0_4 = arith.constant 0 : index
    %12 = vector.load %arg8[%c0_3, %c0_4] : memref<8x32xf32, #tpu.memory_space<vmem>>, vector<8x32xf32>
    %cst_5 = arith.constant dense<0.000000e+00> : vector<8x32xf32>
    %13 = vector.multi_reduction <add>, %11, %cst_5 [1] : vector<8x16x32xf32> to vector<8x32xf32>
    %14 = arith.addf %12, %13 : vector<8x32xf32>
    %c0_6 = arith.constant 0 : index
    %c0_7 = arith.constant 0 : index
    %15 = vector.load %arg8[%c0_6, %c0_7] : memref<8x32xf32, #tpu.memory_space<vmem>>, vector<8x32xf32>
    tpu.vector_store %arg8[%c0_6, %c0_7], %14 {strides = array<i32>} : memref<8x32xf32, #tpu.memory_space<vmem>>, vector<8x32xf32>,
    %c0_i32_8 = arith.constant 0 : i32
    %16 = arith.cmpi eq, %arg1, %c0_i32_8 : i32
    %17 = arith.extui %16 : i1 to i32
    %c0_i32_9 = arith.constant 0 : i32
    %18 = arith.cmpi ne, %17, %c0_i32_9 : i32
    scf.if %18 {
      %c0_10 = arith.constant 0 : index
      %c0_11 = arith.constant 0 : index
      %19 = vector.load %arg8[%c0_10, %c0_11] : memref<8x32xf32, #tpu.memory_space<vmem>>, vector<8x32xf32>
      %cst_12 = arith.constant 1.000000e-01 : f32
      %20 = vector.broadcast %cst_12 : f32 to vector<8x32xf32>
      %21 = arith.mulf %19, %20 : vector<8x32xf32>
      %cst_13 = arith.constant dense<0.000000e+00> : vector<8xf32>
      %22 = vector.multi_reduction <add>, %21, %cst_13 [1] : vector<8x32xf32> to vector<8xf32>
      %23 = vector.shape_cast %22 : vector<8xf32> to vector<8x1xf32>
      %cst_14 = arith.constant 3.200000e+01 : f32
      %24 = vector.broadcast %cst_14 : f32 to vector<8x1xf32>
      %25 = arith.divf %23, %24 : vector<8x1xf32>
      %26 = vector.broadcast %25 : vector<8x1xf32> to vector<8x32xf32>
      %27 = arith.subf %21, %26 : vector<8x32xf32>
      %28 = arith.mulf %27, %27 : vector<8x32xf32>
      %cst_15 = arith.constant dense<0.000000e+00> : vector<8xf32>
      %29 = vector.multi_reduction <add>, %28, %cst_15 [1] : vector<8x32xf32> to vector<8xf32>
      %30 = vector.shape_cast %29 : vector<8xf32> to vector<8x1xf32>
      %cst_16 = arith.constant 3.200000e+01 : f32
      %31 = vector.broadcast %cst_16 : f32 to vector<8x1xf32>
      %32 = arith.divf %30, %31 : vector<8x1xf32>
      %cst_17 = arith.constant 9.99999974E-6 : f32
      %33 = vector.broadcast %cst_17 : f32 to vector<8x1xf32>
      %34 = arith.addf %32, %33 : vector<8x1xf32>
      %35 = math.rsqrt %34 : vector<8x1xf32>
      %36 = vector.broadcast %35 : vector<8x1xf32> to vector<8x32xf32>
      %37 = arith.mulf %27, %36 : vector<8x32xf32>
      %c0_18 = arith.constant 0 : index
      %c0_19 = arith.constant 0 : index
      %38 = vector.load %arg3[%c0_18, %c0_19] : memref<1x32xf32, #tpu.memory_space<vmem>>, vector<1x32xf32>
      %39 = vector.broadcast %38 : vector<1x32xf32> to vector<8x32xf32>
      %40 = arith.mulf %37, %39 : vector<8x32xf32>
      %c0_20 = arith.constant 0 : index
      %c0_21 = arith.constant 0 : index
      %41 = vector.load %arg4[%c0_20, %c0_21] : memref<1x32xf32, #tpu.memory_space<vmem>>, vector<1x32xf32>
      %42 = vector.broadcast %41 : vector<1x32xf32> to vector<8x32xf32>
      %43 = arith.addf %40, %42 : vector<8x32xf32>
      %c0_22 = arith.constant 0 : index
      %c0_23 = arith.constant 0 : index
      %44 = vector.load %arg5[%c0_22, %c0_23] : memref<32x128xf32, #tpu.memory_space<vmem>>, vector<32x128xf32>
      %cst_24 = arith.constant dense<0.000000e+00> : vector<8x128xf32>
      %45 = tpu.matmul %43, %44, %cst_24 {dimension_numbers = #tpu.dot_dimension_numbers<[1], [0], [0], [1], [0, 0, 1, 1], [], []>} : vector<8x32xf32>, vector<32x128xf32>, vector<8x128xf32> -> vector<8x128xf32>
      %c0_25 = arith.constant 0 : index
      %c0_26 = arith.constant 0 : index
      %46 = vector.load %arg6[%c0_25, %c0_26] : memref<1x128xf32, #tpu.memory_space<vmem>>, vector<1x128xf32>
      %47 = vector.broadcast %46 : vector<1x128xf32> to vector<8x128xf32>
      %48 = arith.addf %45, %47 : vector<8x128xf32>
      %c0_27 = arith.constant 0 : index
      %c0_28 = arith.constant 0 : index
      %49 = vector.load %arg7[%c0_27, %c0_28] : memref<8x128xf32, #tpu.memory_space<vmem>>, vector<8x128xf32>
      tpu.vector_store %arg7[%c0_27, %c0_28], %48 {strides = array<i32>} : memref<8x128xf32, #tpu.memory_space<vmem>>, vector<8x128xf32>,
    } else {
    }
    return
  }
  func.func @transform_0(%arg0: i32, %arg1: i32) -> (i32, i32, i32) {
    %c0_i32 = arith.constant 0 : i32
    %c0_i32_0 = arith.constant 0 : i32
    return %arg0, %arg1, %c0_i32 : i32, i32, i32
  }
  func.func @transform_1(%arg0: i32, %arg1: i32) -> (i32, i32) {
    %c0_i32 = arith.constant 0 : i32
    %c0_i32_0 = arith.constant 0 : i32
    %c0_i32_1 = arith.constant 0 : i32
    return %c0_i32, %c0_i32_0 : i32, i32
  }
  func.func @transform_2(%arg0: i32, %arg1: i32) -> (i32, i32) {
    %c0_i32 = arith.constant 0 : i32
    %c0_i32_0 = arith.constant 0 : i32
    %c0_i32_1 = arith.constant 0 : i32
    return %c0_i32, %c0_i32_0 : i32, i32
  }
  func.func @transform_3(%arg0: i32, %arg1: i32) -> (i32, i32) {
    %c0_i32 = arith.constant 0 : i32
    %c0_i32_0 = arith.constant 0 : i32
    %c0_i32_1 = arith.constant 0 : i32
    return %c0_i32, %c0_i32_0 : i32, i32
  }
  func.func @transform_4(%arg0: i32, %arg1: i32) -> (i32, i32) {
    %c0_i32 = arith.constant 0 : i32
    %c0_i32_0 = arith.constant 0 : i32
    %c0_i32_1 = arith.constant 0 : i32
    return %c0_i32, %c0_i32_0 : i32, i32
  }
  func.func @transform_5(%arg0: i32, %arg1: i32) -> (i32, i32) {
    %c0_i32 = arith.constant 0 : i32
    %c0_i32_0 = arith.constant 0 : i32
    return %arg0, %c0_i32 : i32, i32
  }
}

</mosaic_0001>

<bundles_post_ra>
// kernel: tpu_custom_call.1
= control target key start
LH: loop header
LB: loop body
LE: loop exit
PB: predicated region body
PF: predicated region fallthrough
CT: control target
= control target key end

     0   :  { %vm25_vm0 = vcmask 261120   ;;  %v43_v0 = vlaneseq  ;;  %v361_v1 = vmov 0.0   ;;  %s503_s0 = inlined_call_operand.vmem [shape: f32[2,10,32], index: 0, kind: input, shape index: {}]   ;;  %s504_s1 = inlined_call_operand.vmem [shape: f32[1,32], index: 1, kind: input, shape index: {}]   ;;  %s505_s2 = inlined_call_operand.vmem [shape: f32[1,32], index: 2, kind: input, shape index: {}]   ;;  %s506_s3 = inlined_call_operand.vmem [shape: f32[32,128], index: 3, kind: input, shape index: {}]   ;;  %s507_s4 = inlined_call_operand.vmem [shape: f32[1,128], index: 4, kind: input, shape index: {}]   ;;  %s508_s5 = inlined_call_operand.hbm [shape: f32[2,128], index: 5, kind: output, shape index: {}]  }
   0x1   :  { %26 = vst.msk [vmem:[#allocation2] sm:$0xff] %vm25_vm0, %v361_v1  ;;  %v27_v2 = vld [vmem:[%s503_s0] sm:$0xff]  ;;  %v29_v3 = vld [vmem:[%s503_s0 + $0x10] sm:$0xff]  ;;  %v28_v4 = vld [vmem:[%s503_s0 + $0x8] sm:$0xff] }
   0x2   :  { %v30_v5 = vld [vmem:[%s503_s0 + $0x18] sm:$0xff]  ;;  %v31_v6 = vld [vmem:[%s503_s0 + $0x20] sm:$0xff]  ;;  %v33_v7 = vld [vmem:[%s503_s0 + $0x30] sm:$0xff]  ;;  %v44_v9 = vshrl.u32 %v43_v0, 7  ;;  %v70_v17 = vsel %vm25_vm0, %v27_v2, 0.0  ;;  %v79_v18 = vsel %vm25_vm0, %v29_v3, 0.0 }
   0x3   :  { %v35_v8 = vld [vmem:[%s503_s0 + $0x40] sm:$0xff]  ;;  %v32_v10 = vld [vmem:[%s503_s0 + $0x28] sm:$0xff]  ;;  %v34_v11 = vld [vmem:[%s503_s0 + $0x38] sm:$0xff]  ;;  %v88_v22 = vsel %vm25_vm0, %v31_v6, 0.0  ;;  %v97_v23 = vsel %vm25_vm0, %v33_v7, 0.0 }
   0x4   :  { %v37_v12 = vld [vmem:[%s503_s0 + $0x50] sm:$0xff]  ;;  %v36_v13 = vld [vmem:[%s503_s0 + $0x48] sm:$0xff]  ;;  %v39_v14 = vld [vmem:[%s503_s0 + $0x60] sm:$0xff]  ;;  %v45_v16 = vadd.s32 8, %v44_v9  ;;  %v106_v24 = vsel %vm25_vm0, %v35_v8, 0.0 }
   0x5   :  { %v41_v15 = vld [vmem:[%s503_s0 + $0x70] sm:$0xff]  ;;  %v38_v19 = vld [vmem:[%s503_s0 + $0x58] sm:$0xff]  ;;  %v40_v20 = vld [vmem:[%s503_s0 + $0x68] sm:$0xff]  ;;  %v115_v25 = vsel %vm25_vm0, %v37_v12, 0.0  ;;  %v124_v26 = vsel %vm25_vm0, %v39_v14, 0.0 }
   0x6   :  { %v42_v21 = vld [vmem:[%s503_s0 + $0x78] sm:$0xff]  ;;  %vm51_vm1 = vcmp.lt.s32.totalorder %v45_v16, 10  ;;  %v133_v27 = vsel %vm25_vm0, %v41_v15, 0.0 }
   0x7   :  { %10 = vsyncpa [#allocation4], 0  ;;  %v53_v28 = vsel %vm51_vm1, %v28_v4, 0.0  ;;  %v55_v29 = vsel %vm51_vm1, %v30_v5, 0.0  ;;  %v57_v30 = vsel %vm51_vm1, %v32_v10, 0.0  ;;  %v59_v31 = vsel %vm51_vm1, %v34_v11, 0.0 }
   0x8   :  { %v61_v32 = vsel %vm51_vm1, %v36_v13, 0.0  ;;  %v63_v33 = vsel %vm51_vm1, %v38_v19, 0.0  ;;  %v65_v34 = vsel %vm51_vm1, %v40_v20, 0.0  ;;  %v67_v35 = vsel %vm51_vm1, %v42_v21, 0.0 }
   0x9   :  { %v71_v36 = vsel %vm25_vm0, %v53_v28, 0.0  ;;  %v80_v37 = vsel %vm25_vm0, %v55_v29, 0.0  ;;  %v89_v38 = vsel %vm25_vm0, %v57_v30, 0.0  ;;  %v98_v39 = vsel %vm25_vm0, %v59_v31, 0.0 }
   0xa   :  { %v72_v40 = vadd.f32 %v71_v36, %v70_v17  ;;  %v81_v41 = vadd.f32 %v80_v37, %v79_v18  ;;  %v90_v42 = vadd.f32 %v89_v38, %v88_v22  ;;  %v99_v43 = vadd.f32 %v98_v39, %v97_v23 }
   0xb   :  { %v107_v44 = vsel %vm25_vm0, %v61_v32, 0.0  ;;  %v116_v45 = vsel %vm25_vm0, %v63_v33, 0.0  ;;  %v125_v46 = vsel %vm25_vm0, %v65_v34, 0.0  ;;  %v134_v47 = vsel %vm25_vm0, %v67_v35, 0.0 }
   0xc   :  { %v73_v48 = vrot.slane %v72_v40, 4  ;;  %v82_v49 = vrot.slane %v81_v41, 4  ;;  %v91_v50 = vrot.slane %v90_v42, 4  ;;  %v100_v51 = vrot.slane %v99_v43, 4 }
   0xd   :  { %v108_v52 = vadd.f32 %v107_v44, %v106_v24  ;;  %v117_v53 = vadd.f32 %v116_v45, %v115_v25  ;;  %v126_v54 = vadd.f32 %v125_v46, %v124_v26  ;;  %v135_v55 = vadd.f32 %v134_v47, %v133_v27 }
   0xe   :  { %vm150_vm2 = vcmask 1041409   ;;  %v74_v56 = vadd.f32 %v73_v48, %v72_v40  ;;  %v83_v57 = vadd.f32 %v82_v49, %v81_v41  ;;  %v92_v58 = vadd.f32 %v91_v50, %v90_v42  ;;  %v68_v41 = vld [vmem:[#allocation2] sm:$0xff] }
   0xf   :  { %v101_v59 = vadd.f32 %v100_v51, %v99_v43  ;;  %v109_v60 = vrot.slane %v108_v52, 4  ;;  %v118_v61 = vrot.slane %v117_v53, 4  ;;  %v127_v62 = vrot.slane %v126_v54, 4 }
  0x10   :  { %v136_v63 = vrot.slane %v135_v55, 4  ;;  %vm152_vm3 = vcmask 1042434   ;;  %v75_v0 = vrot.slane %v74_v56, 2  ;;  %v84_v2 = vrot.slane %v83_v57, 2 }
  0x11   :  { %v93_v3 = vrot.slane %v92_v58, 2  ;;  %v102_v4 = vrot.slane %v101_v59, 2  ;;  %v110_v5 = vadd.f32 %v109_v60, %v108_v52  ;;  %v119_v6 = vadd.f32 %v118_v61, %v117_v53 }
  0x12   :  { %v128_v7 = vadd.f32 %v127_v62, %v126_v54  ;;  %v137_v8 = vadd.f32 %v136_v63, %v135_v55  ;;  %v76_v9 = vadd.f32 %v75_v0, %v74_v56  ;;  %v85_v10 = vadd.f32 %v84_v2, %v83_v57  ;;  %v202_v54 = vld [vmem:[%s506_s3] sm:$0xff]  ;;  %v203_v55 = vld [vmem:[%s506_s3 + $0x8] sm:$0xff]  ;;  %v204_v56 = vld [vmem:[%s506_s3 + $0x10] sm:$0xff] }
  0x13   :  { %v94_v11 = vadd.f32 %v93_v3, %v92_v58  ;;  %v103_v12 = vadd.f32 %v102_v4, %v101_v59  ;;  %v111_v13 = vrot.slane %v110_v5, 2  ;;  %v120_v14 = vrot.slane %v119_v6, 2  ;;  %v205_v59 = vld [vmem:[%s506_s3 + $0x18] sm:$0xff]  ;;  %v303_v2 = vld [vmem:[%s504_s1] ss:$0 sm:$0xff] }
  0x14   :  { %v129_v15 = vrot.slane %v128_v7, 2  ;;  %v138_v16 = vrot.slane %v137_v8, 2  ;;  %v77_v17 = vrot.slane %v76_v9, 1  ;;  %v86_v18 = vrot.slane %v85_v10, 1  ;;  %v304_v4 = vld [vmem:[%s505_s2] ss:$0 sm:$0xff] }
  0x15   :  { %v95_v19 = vrot.slane %v94_v11, 1  ;;  %v104_v20 = vrot.slane %v103_v12, 1  ;;  %v112_v21 = vadd.f32 %v111_v13, %v110_v5  ;;  %v121_v22 = vadd.f32 %v120_v14, %v119_v6  ;;  %v305_v6 = vld [vmem:[%s507_s4] ss:$0 sm:$0xff] }
  0x16   :  { %v130_v23 = vadd.f32 %v129_v15, %v128_v7  ;;  %v139_v24 = vadd.f32 %v138_v16, %v137_v8  ;;  %v78_v25 = vadd.f32 %v77_v17, %v76_v9  ;;  %v87_v26 = vadd.f32 %v86_v18, %v85_v10 }
  0x17   :  { %v96_v27 = vadd.f32 %v95_v19, %v94_v11  ;;  %v105_v28 = vadd.f32 %v104_v20, %v103_v12  ;;  %v113_v29 = vrot.slane %v112_v21, 1  ;;  %v122_v30 = vrot.slane %v121_v22, 1 }
  0x18   :  { %v131_v31 = vrot.slane %v130_v23, 1  ;;  %v140_v32 = vrot.slane %v139_v24, 1  ;;  %v151_v33 = vsel %vm150_vm2, %v87_v26, %v78_v25  ;;  %vm154_vm4 = vcmask 1043459  }
  0x19   :  { %v114_v34 = vadd.f32 %v113_v29, %v112_v21  ;;  %v123_v35 = vadd.f32 %v122_v30, %v121_v22  ;;  %vm156_vm5 = vcmask 1044484   ;;  %v153_v37 = vsel %vm152_vm3, %v96_v27, %v151_v33 }
  0x1a   :  { %v132_v36 = vadd.f32 %v131_v31, %v130_v23  ;;  %vm158_vm6 = vcmask 1045509   ;;  %v141_v38 = vadd.f32 %v140_v32, %v139_v24  ;;  %v155_v39 = vsel %vm154_vm4, %v105_v28, %v153_v37 }
  0x1b   :  { %vm160_vm7 = vcmask 1046534   ;;  %v157_v40 = vsel %vm156_vm5, %v114_v34, %v155_v39  ;;  %vm162_vm8 = vcmask 1047559   ;;  %v362_v57 = vmov 0.0|0.0  }
  0x1c   :  { %v159_v42 = vsel %vm158_vm6, %v123_v35, %v157_v40  ;;  %323 = vmatprep.subr.bf16.mxu0 %v362_v57  ;;  %v324_v58 = vpack.c.bf16 %v203_v55, %v202_v54  ;;  %vm363_vm9 = vmmov 0   ;;  %v327_v60 = vpack.c.bf16 %v205_v59, %v204_v56 }
  0x1d   :  { %v161_v43 = vsel %vm160_vm7, %v132_v36, %v159_v42  ;;  %320 = vmatprep.mubr.msk.f32.mxu0 %vm363_vm9, %v361_v1 }
  0x1e   :  { %v163_v44 = vsel %vm162_vm8, %v141_v38, %v161_v43  ;;  %325 = vmatpush3.bf16.msra.mxu0 %v324_v58 }
  0x1f   :  { %v165_v45 = vadd.f32 %v163_v44, %v68_v41  ;;  %326 = vmatprep.subr.bf16.mxu0 %v362_v57 }
  0x21   :  { %166 = vst.msk [vmem:[#allocation2] sm:$0xff] %vm25_vm0, %v165_v45 }
  0x22   :  { %328 = vmatpush3.bf16.msra.mxu0 %v327_v60 }
  0x28   :  { %v170_v46 = vld [vmem:[#allocation2] sm:$0xff] }
  0x29   :  { %v171_v47 = vmul.f32 0.1, %v170_v46 }
  0x2b   :  { %v172_v48 = vsel %vm25_vm0, %v171_v47, 0.0 }
  0x2c   :  { %173 = vadd.xlane.f32.xlu0 %v172_v48 }
  0xb9   :  { %v174_v49 = vpop.xlane.xlu0 %173 }
  0xba   :  { %v176_v50 = vmul.f32 0.03125, %v174_v49 }
  0xbc   :  { %v177_v51 = vsub.f32 %v171_v47, %v176_v50 }
  0xbe   :  { %v178_v52 = vmul.f32 %v177_v51, %v177_v51 }
  0xc0   :  { %v179_v53 = vsel %vm25_vm0, %v178_v52, 0.0 }
  0xc1   :  { %180 = vadd.xlane.f32.xlu0 %v179_v53 }
 0x14e   :  { %v181_v61 = vpop.xlane.xlu0 %180 }
 0x14f   :  { %v182_v62 = vmul.f32 0.03125, %v181_v61 }
 0x151   :  { %v183_v63 = vadd.f32 1e-05, %v182_v62 }
 0x153   :  { %335 = vrsqrt.f32 %v183_v63 }
 0x15d   :  { %v336_v0 = vpop.eup %335 }
 0x15e   :  { %v185_v3 = vmul.f32 %v336_v0, %v177_v51 }
 0x160   :  { %v193_v5 = vmul.f32 %v303_v2, %v185_v3 }
 0x162   :  { %v201_v1 = vadd.f32 %v304_v4, %v193_v5 }
 0x164   :  { %321 = vmatmul.mubr.msk.f32.vlgmr.msra.gmra.mrb[0].mxu0 %vm25_vm0, %v201_v1 }
 0x237   :  { %v282_v7 = vpop.f32.mrb[0].mxu0 }
 0x238   :  { %v283_v8 = vadd.f32 %v305_v6, %v282_v7  ;;  %v322_v9 = vpop.f32.mrb[1].mxu0 }
 0x23a   :  { %286 = vst [vmem:[#allocation3] sm:$0xff] %v283_v8 }
 0x23b   :  { %291 = vsyncadd [#allocation4], 96  ;;  %s364_s12 = smov [#allocation3]  }
 0x23c   :  { %s292_s1 = sshll.u32 %s364_s12, 4  ;;  %s293_s1 = int_to_ptr.vmem [resolvable:$true] %s292_s1 }
 0x23d   :  { %s337_s13 = scalar_lea.vmem %s293_s1, 32  ;;  %s341_s14 = scalar_lea.vmem %s293_s1, 128 }
 0x23e   :  { %p338_p0 = scmp.ne.s32.totalorder %s293_s1, %s337_s13  ;;  %p342_p1 = scmp.lt.s32.totalorder %s293_s1, %s293_s1 }
 0x23f   :  { %p343_p2 = scmp.lt.s32.totalorder %s341_s14, %s337_s13 }
 0x241   :  { %p344_p3 = por %p343_p2, %p342_p1 }
 0x243   :  { %p345_p4 = pnand %p344_p3, %p338_p0 }
 0x245   :  { %348 = shalt.err (!%p345_p4)
}
 0x246   :  { %s349_s4 = scalar_lea.hbm %s508_s5, 32 }
 0x247   :  { %p350_p5 = scmp.ne.s32.totalorder %s508_s5, %s349_s4  ;;  %p353_p6 = scmp.lt.u32.totalorder %s349_s4, %s508_s5 }
 0x249   :  { %p355_p7 = pnand %p353_p6, %p350_p5 }
 0x24b   :  { %358 = shalt.err (!%p355_p7)
}
 0x24c   :  { %s365_s20 = smov 32   ;;  %s366_s21 = smov 2  }
 0x24d   :  { %298 = dma.vmem_to_hbm [thread:$0]  %s293_s1, 32, %s508_s5, [#allocation4], %s365_s20, %s365_s20, %s366_s21  }
 0x24e   :  { %359 = dma.done.wait [#allocation4], 128  }
 0x24f   :  { %360 = vsyncadd [#allocation4], 4294967168 }
 0x250   :  { %302 = vsyncpa [#allocation4], 1 }

</bundles_post_ra>
